<compile_context>
chip_gen: v5e
topology: v5e:2x2
jax: 0.10.0
libtpu: 0.0.40
codegen_flags: <defaults>
</compile_context>

<pallas_src>
import jax
import jax.numpy as jnp
from jax.experimental import pallas as pl
from jax.experimental.pallas import tpu as pltpu

EPS = 1e-6            # matches torch eps=1e-6
_LANES = 1024         # C: lane width of each coordinate plane (multiple of 128)
_MAX_ROWS = 128       # TR cap: up to 128*1024 = 131072 boxes per grid step


def _round_up(a: int, b: int) -> int:
    return ((a + b - 1) // b) * b


def _num_tensorcores() -> int:
    """Best-effort TensorCore count (v7x has 2; v5e/v6e have 1)."""
    try:
        info = pltpu.get_tpu_info()
    except Exception:
        return 1
    for name in ("num_cores", "core_count", "num_tensor_cores",
                 "tensor_cores_per_chip"):
        v = getattr(info, name, None)
        if isinstance(v, int) and v in (1, 2):
            return v
    return 1


def _iou_loss_sum_kernel(n_ref, x_ref, o_ref, acc_ref):
    """Accumulate sum_b (1 - IoU_3d(pred_b, target_b)) for this core's shard.

    n_ref:   (1,) int32 SMEM scalar prefetch -- true number of boxes
    x_ref:   (12, TR, C) packed coordinate planes (pred then target)
    o_ref:   (1, 128) per-core output slab (scalar partial in lane 0)
    acc_ref: (TR, C) f32 VMEM accumulator (per core)
    """
    c_ax = pl.program_id(0)            # core shard (parallel axis)
    j = pl.program_id(1)               # lane block within shard (reduction)
    nbc = pl.num_programs(1)
    tr = x_ref.shape[1]
    cc = x_ref.shape[2]
    boxes_per_block = tr * cc

    @pl.when(j == 0)
    def _():
        acc_ref[...] = jnp.zeros_like(acc_ref)

    f32 = jnp.float32
    px1 = x_ref[0].astype(f32)
    py1 = x_ref[1].astype(f32)
    pz1 = x_ref[2].astype(f32)
    px2 = x_ref[3].astype(f32)
    py2 = x_ref[4].astype(f32)
    pz2 = x_ref[5].astype(f32)
    tx1 = x_ref[6].astype(f32)
    ty1 = x_ref[7].astype(f32)
    tz1 = x_ref[8].astype(f32)
    tx2 = x_ref[9].astype(f32)
    ty2 = x_ref[10].astype(f32)
    tz2 = x_ref[11].astype(f32)

    # All operands are dense (TR, C) planes -> no sublane relayout.
    area_p = (px2 - px1) * (py2 - py1) * (pz2 - pz1)
    area_t = (tx2 - tx1) * (ty2 - ty1) * (tz2 - tz1)
    wx = jnp.maximum(jnp.minimum(px2, tx2) - jnp.maximum(px1, tx1), 0.0)
    wy = jnp.maximum(jnp.minimum(py2, ty2) - jnp.maximum(py1, ty1), 0.0)
    wz = jnp.maximum(jnp.minimum(pz2, tz2) - jnp.maximum(pz1, tz1), 0.0)
    overlap = wx * wy * wz
    union = jnp.maximum(area_p + area_t - overlap, EPS)
    loss = 1.0 - overlap / union                     # (TR, C)

    n_valid = n_ref[0]
    start = (c_ax * nbc + j) * boxes_per_block

    # Fast path: block fully inside the valid range -> plain accumulate.
    @pl.when(start + boxes_per_block <= n_valid)
    def _():
        acc_ref[...] += loss

    # Slow path: block straddles / exceeds n -> mask padded boxes.
    @pl.when(start + boxes_per_block > n_valid)
    def _():
        r = jax.lax.broadcasted_iota(jnp.int32, (tr, cc), 0)
        c = jax.lax.broadcasted_iota(jnp.int32, (tr, cc), 1)
        idx = start + r * cc + c
        acc_ref[...] += jnp.where(idx < n_valid, loss, 0.0)

    # One full reduction per core, only on its last block.
    @pl.when(j == nbc - 1)
    def _():
        total = jnp.sum(acc_ref[...])
        lane = jax.lax.broadcasted_iota(jnp.int32, (1, 128), 1)
        o_ref[...] = jnp.where(lane == 0, total, 0.0)


def _pack_boxes(pred, target, n, n_pad, lanes):
    """Pack pred/target into coord-plane-major x[12, n_pad//lanes, lanes]."""
    p2 = pred.reshape(n, 6)
    t2 = target.reshape(n, 6)
    x = jnp.concatenate([p2, t2], axis=-1)           # (n, 12)
    if n_pad > n:
        x = jnp.pad(x, ((0, n_pad - n), (0, 0)))     # zero pad; masked in-kernel
    return x.T.reshape(12, n_pad // lanes, lanes)


def _iou_loss_sum(pred, target, n, ncores, *, lanes=_LANES, max_rows=_MAX_ROWS):
    """Returns sum_b (1 - IoU_3d) as an f32 scalar via the Pallas kernel."""
    rows_needed = pl.cdiv(n, lanes)
    tr = min(max_rows, max(8, _round_up(rows_needed, 8)))
    boxes_per_block = tr * lanes
    nblk = _round_up(pl.cdiv(n, boxes_per_block), ncores)
    nbc = nblk // ncores
    n_pad = nblk * boxes_per_block

    x = _pack_boxes(pred, target, n, n_pad, lanes)
    n_arr = jnp.array([n], dtype=jnp.int32)

    if ncores > 1:
        dims = (pltpu.CORE_PARALLEL, pltpu.ARBITRARY)
    else:
        dims = (pltpu.ARBITRARY, pltpu.ARBITRARY)

    cost = pl.CostEstimate(
        flops=30 * n_pad,
        transcendentals=n_pad,                       # one divide per box
        bytes_accessed=int(x.size) * x.dtype.itemsize + 4 * 128 * ncores + 4,
    )

    partials = pl.pallas_call(
        _iou_loss_sum_kernel,
        out_shape=jax.ShapeDtypeStruct((1, 128 * ncores), jnp.float32),
        grid_spec=pltpu.PrefetchScalarGridSpec(
            num_scalar_prefetch=1,
            grid=(ncores, nbc),
            in_specs=[
                pl.BlockSpec((12, tr, lanes),
                             lambda c, j, n_ref: (0, c * nbc + j, 0)),
            ],
            out_specs=pl.BlockSpec((1, 128), lambda c, j, n_ref: (0, c)),
            scratch_shapes=[pltpu.VMEM((tr, lanes), jnp.float32)],
        ),
        compiler_params=pltpu.CompilerParams(
            dimension_semantics=dims,
            vmem_limit_bytes=32 * 1024 * 1024,
        ),
        cost_estimate=cost,
    )(n_arr, x)

    return jnp.sum(partials)        # non-lane-0 entries are exact zeros


def axis_aligned_iou_loss_pallas(pred, target, reduction="mean", loss_weight=1.0):
    """Equivalent of AxisAlignedIoULoss(mode='iou', reduction=..., loss_weight=...)
    forward with weight=None, avg_factor=None."""
    assert pred.shape == target.shape and pred.shape[-1] == 6
    if reduction not in ("mean", "sum"):
        # TODO(synk): reduction='none' (per-box output) needs a per-box output
        # BlockSpec instead of the sum-accumulating kernel.
        raise NotImplementedError("reduction='none' not implemented")

    n = 1
    for d in pred.shape[:-1]:
        n *= d
    if n == 0:
        # torch: sum() of empty -> 0, mean() of empty -> nan.
        base = jnp.float32(0.0) if reduction == "sum" else jnp.float32(float("nan"))
        return base * loss_weight

    ncores = _num_tensorcores()
    try:
        loss_sum = _iou_loss_sum(pred, target, n, ncores)
    except Exception:
        if ncores == 1:
            raise
        # TODO(synk): CORE_PARALLEL lowering unavailable on this JAX/chip --
        # fall back to the single-core grid (correct, just no 2-TC split).
        loss_sum = _iou_loss_sum(pred, target, n, 1)

    if reduction == "mean":
        loss = loss_sum / n
    else:
        loss = loss_sum
    return loss * loss_weight


def _reference_iou_loss(pred, target, reduction="mean", loss_weight=1.0):
    """Pure-JAX reference mirroring the torch code (is_aligned=True, mode='iou')."""
    p = pred.reshape(-1, 6).astype(jnp.float32)
    t = target.reshape(-1, 6).astype(jnp.float32)
    area1 = (p[:, 3] - p[:, 0]) * (p[:, 4] - p[:, 1]) * (p[:, 5] - p[:, 2])
    area2 = (t[:, 3] - t[:, 0]) * (t[:, 4] - t[:, 1]) * (t[:, 5] - t[:, 2])
    lt = jnp.maximum(p[:, :3], t[:, :3])
    rb = jnp.minimum(p[:, 3:], t[:, 3:])
    wh = jnp.maximum(rb - lt, 0.0)
    overlap = wh[:, 0] * wh[:, 1] * wh[:, 2]
    union = jnp.maximum(area1 + area2 - overlap, EPS)
    loss = 1.0 - overlap / union
    if reduction == "mean":
        loss = loss.mean()
    elif reduction == "sum":
        loss = loss.sum()
    return loss * loss_weight


def _make_boxes(key, shape_prefix):
    k1, k2, k3, k4 = jax.random.split(key, 4)
    pmin = jax.random.uniform(k1, shape_prefix + (3,), minval=0.0, maxval=10.0)
    psz = jax.random.uniform(k2, shape_prefix + (3,), minval=0.5, maxval=5.0)
    pred = jnp.concatenate([pmin, pmin + psz], axis=-1)
    tmin = pmin + jax.random.uniform(k3, shape_prefix + (3,), minval=-1.0, maxval=1.0)
    tsz = psz + jax.random.uniform(k4, shape_prefix + (3,), minval=-0.3, maxval=0.3)
    target = jnp.concatenate([tmin, tmin + tsz], axis=-1)
    return pred, target


if __name__ == "__main__":
    key = jax.random.PRNGKey(0)
    k_small, k_med = jax.random.split(key, 2)

    # Small shapes consistent with the module: pred/target [..., 6] -> (2, 8, 6)
    B, M = 2, 8
    pred, target = _make_boxes(k_small, (B, M))

    out_mean = jax.block_until_ready(
        axis_aligned_iou_loss_pallas(pred, target, reduction="mean", loss_weight=1.0))
    ref_mean = _reference_iou_loss(pred, target, reduction="mean", loss_weight=1.0)
    assert jnp.allclose(out_mean, ref_mean, atol=1e-5, rtol=1e-5), (out_mean, ref_mean)

    out_sum = jax.block_until_ready(
        axis_aligned_iou_loss_pallas(pred, target, reduction="sum", loss_weight=0.5))
    ref_sum = _reference_iou_loss(pred, target, reduction="sum", loss_weight=0.5)
    assert jnp.allclose(out_sum, ref_sum, atol=1e-5, rtol=1e-5), (out_sum, ref_sum)

    # Exercise the multi-block accumulation + masked ragged-tail path with a
    # reduced block size (still small shapes: 3 x 700 boxes).
    pred2, target2 = _make_boxes(k_med, (3, 700))
    med_sum = jax.block_until_ready(
        _iou_loss_sum(pred2, target2, 3 * 700, 1, lanes=256, max_rows=8))
    ref_med = _reference_iou_loss(pred2, target2, reduction="sum", loss_weight=1.0)
    assert jnp.allclose(med_sum, ref_med, atol=1e-3, rtol=1e-4), (med_sum, ref_med)

    print("KERNEL_OK")
</pallas_src>

<mosaic_0001>
module attributes {stable_mosaic.version = 11 : i64} {
  func.func @_iou_loss_sum_kernel(%arg0: i32, %arg1: i32, %arg2: memref<1xi32, #tpu.memory_space<smem>>, %arg3: memref<12x8x1024xf32, #tpu.memory_space<vmem>>, %arg4: memref<1x128xf32, #tpu.memory_space<vmem>>, %arg5: memref<8x1024xf32, #tpu.memory_space<vmem>>) attributes {dimension_semantics = [#tpu.dimension_semantics<arbitrary>, #tpu.dimension_semantics<arbitrary>], iteration_bounds = array<i64: 1, 1>, scalar_prefetch = 1 : i64, scratch_operands = 1 : i64, tpu.core_type = #tpu.core_type<tc>, window_params = [{transform_indices = @transform_0, window_bounds = array<i64: 12, 8, 1024>}, {transform_indices = @transform_1, window_bounds = array<i64: 1, 128>}]} {
    %c0_i32 = arith.constant 0 : i32
    %0 = arith.cmpi eq, %arg1, %c0_i32 : i32
    %1 = arith.extui %0 : i1 to i32
    %c0_i32_0 = arith.constant 0 : i32
    %2 = arith.cmpi ne, %1, %c0_i32_0 : i32
    scf.if %2 {
      %cst_36 = arith.constant 0.000000e+00 : f32
      %76 = vector.broadcast %cst_36 : f32 to vector<8x1024xf32>
      %c0_37 = arith.constant 0 : index
      %c0_38 = arith.constant 0 : index
      %77 = vector.load %arg5[%c0_37, %c0_38] : memref<8x1024xf32, #tpu.memory_space<vmem>>, vector<8x1024xf32>
      tpu.vector_store %arg5[%c0_37, %c0_38], %76 {strides = array<i32>} : memref<8x1024xf32, #tpu.memory_space<vmem>>, vector<8x1024xf32>,
    } else {
    }
    %c0 = arith.constant 0 : index
    %c0_1 = arith.constant 0 : index
    %c0_2 = arith.constant 0 : index
    %3 = vector.load %arg3[%c0, %c0_1, %c0_2] : memref<12x8x1024xf32, #tpu.memory_space<vmem>>, vector<1x8x1024xf32>
    %4 = vector.shape_cast %3 : vector<1x8x1024xf32> to vector<8x1024xf32>
    %c1 = arith.constant 1 : index
    %c0_3 = arith.constant 0 : index
    %c0_4 = arith.constant 0 : index
    %5 = vector.load %arg3[%c1, %c0_3, %c0_4] : memref<12x8x1024xf32, #tpu.memory_space<vmem>>, vector<1x8x1024xf32>
    %6 = vector.shape_cast %5 : vector<1x8x1024xf32> to vector<8x1024xf32>
    %c2 = arith.constant 2 : index
    %c0_5 = arith.constant 0 : index
    %c0_6 = arith.constant 0 : index
    %7 = vector.load %arg3[%c2, %c0_5, %c0_6] : memref<12x8x1024xf32, #tpu.memory_space<vmem>>, vector<1x8x1024xf32>
    %8 = vector.shape_cast %7 : vector<1x8x1024xf32> to vector<8x1024xf32>
    %c3 = arith.constant 3 : index
    %c0_7 = arith.constant 0 : index
    %c0_8 = arith.constant 0 : index
    %9 = vector.load %arg3[%c3, %c0_7, %c0_8] : memref<12x8x1024xf32, #tpu.memory_space<vmem>>, vector<1x8x1024xf32>
    %10 = vector.shape_cast %9 : vector<1x8x1024xf32> to vector<8x1024xf32>
    %c4 = arith.constant 4 : index
    %c0_9 = arith.constant 0 : index
    %c0_10 = arith.constant 0 : index
    %11 = vector.load %arg3[%c4, %c0_9, %c0_10] : memref<12x8x1024xf32, #tpu.memory_space<vmem>>, vector<1x8x1024xf32>
    %12 = vector.shape_cast %11 : vector<1x8x1024xf32> to vector<8x1024xf32>
    %c5 = arith.constant 5 : index
    %c0_11 = arith.constant 0 : index
    %c0_12 = arith.constant 0 : index
    %13 = vector.load %arg3[%c5, %c0_11, %c0_12] : memref<12x8x1024xf32, #tpu.memory_space<vmem>>, vector<1x8x1024xf32>
    %14 = vector.shape_cast %13 : vector<1x8x1024xf32> to vector<8x1024xf32>
    %c6 = arith.constant 6 : index
    %c0_13 = arith.constant 0 : index
    %c0_14 = arith.constant 0 : index
    %15 = vector.load %arg3[%c6, %c0_13, %c0_14] : memref<12x8x1024xf32, #tpu.memory_space<vmem>>, vector<1x8x1024xf32>
    %16 = vector.shape_cast %15 : vector<1x8x1024xf32> to vector<8x1024xf32>
    %c7 = arith.constant 7 : index
    %c0_15 = arith.constant 0 : index
    %c0_16 = arith.constant 0 : index
    %17 = vector.load %arg3[%c7, %c0_15, %c0_16] : memref<12x8x1024xf32, #tpu.memory_space<vmem>>, vector<1x8x1024xf32>
    %18 = vector.shape_cast %17 : vector<1x8x1024xf32> to vector<8x1024xf32>
    %c8 = arith.constant 8 : index
    %c0_17 = arith.constant 0 : index
    %c0_18 = arith.constant 0 : index
    %19 = vector.load %arg3[%c8, %c0_17, %c0_18] : memref<12x8x1024xf32, #tpu.memory_space<vmem>>, vector<1x8x1024xf32>
    %20 = vector.shape_cast %19 : vector<1x8x1024xf32> to vector<8x1024xf32>
    %c9 = arith.constant 9 : index
    %c0_19 = arith.constant 0 : index
    %c0_20 = arith.constant 0 : index
    %21 = vector.load %arg3[%c9, %c0_19, %c0_20] : memref<12x8x1024xf32, #tpu.memory_space<vmem>>, vector<1x8x1024xf32>
    %22 = vector.shape_cast %21 : vector<1x8x1024xf32> to vector<8x1024xf32>
    %c10 = arith.constant 10 : index
    %c0_21 = arith.constant 0 : index
    %c0_22 = arith.constant 0 : index
    %23 = vector.load %arg3[%c10, %c0_21, %c0_22] : memref<12x8x1024xf32, #tpu.memory_space<vmem>>, vector<1x8x1024xf32>
    %24 = vector.shape_cast %23 : vector<1x8x1024xf32> to vector<8x1024xf32>
    %c11 = arith.constant 11 : index
    %c0_23 = arith.constant 0 : index
    %c0_24 = arith.constant 0 : index
    %25 = vector.load %arg3[%c11, %c0_23, %c0_24] : memref<12x8x1024xf32, #tpu.memory_space<vmem>>, vector<1x8x1024xf32>
    %26 = vector.shape_cast %25 : vector<1x8x1024xf32> to vector<8x1024xf32>
    %27 = arith.subf %10, %4 : vector<8x1024xf32>
    %28 = arith.subf %12, %6 : vector<8x1024xf32>
    %29 = arith.mulf %27, %28 : vector<8x1024xf32>
    %30 = arith.subf %14, %8 : vector<8x1024xf32>
    %31 = arith.mulf %29, %30 : vector<8x1024xf32>
    %32 = arith.subf %22, %16 : vector<8x1024xf32>
    %33 = arith.subf %24, %18 : vector<8x1024xf32>
    %34 = arith.mulf %32, %33 : vector<8x1024xf32>
    %35 = arith.subf %26, %20 : vector<8x1024xf32>
    %36 = arith.mulf %34, %35 : vector<8x1024xf32>
    %37 = arith.minimumf %10, %22 : vector<8x1024xf32>
    %38 = arith.maximumf %4, %16 : vector<8x1024xf32>
    %39 = arith.subf %37, %38 : vector<8x1024xf32>
    %cst = arith.constant 0.000000e+00 : f32
    %40 = vector.broadcast %cst : f32 to vector<8x1024xf32>
    %41 = arith.maximumf %39, %40 : vector<8x1024xf32>
    %42 = arith.minimumf %12, %24 : vector<8x1024xf32>
    %43 = arith.maximumf %6, %18 : vector<8x1024xf32>
    %44 = arith.subf %42, %43 : vector<8x1024xf32>
    %cst_25 = arith.constant 0.000000e+00 : f32
    %45 = vector.broadcast %cst_25 : f32 to vector<8x1024xf32>
    %46 = arith.maximumf %44, %45 : vector<8x1024xf32>
    %47 = arith.minimumf %14, %26 : vector<8x1024xf32>
    %48 = arith.maximumf %8, %20 : vector<8x1024xf32>
    %49 = arith.subf %47, %48 : vector<8x1024xf32>
    %cst_26 = arith.constant 0.000000e+00 : f32
    %50 = vector.broadcast %cst_26 : f32 to vector<8x1024xf32>
    %51 = arith.maximumf %49, %50 : vector<8x1024xf32>
    %52 = arith.mulf %41, %46 : vector<8x1024xf32>
    %53 = arith.mulf %52, %51 : vector<8x1024xf32>
    %54 = arith.addf %31, %36 : vector<8x1024xf32>
    %55 = arith.subf %54, %53 : vector<8x1024xf32>
    %cst_27 = arith.constant 9.99999997E-7 : f32
    %56 = vector.broadcast %cst_27 : f32 to vector<8x1024xf32>
    %57 = arith.maximumf %55, %56 : vector<8x1024xf32>
    %58 = arith.divf %53, %57 : vector<8x1024xf32>
    %cst_28 = arith.constant 1.000000e+00 : f32
    %59 = vector.broadcast %cst_28 : f32 to vector<8x1024xf32>
    %60 = arith.subf %59, %58 : vector<8x1024xf32>
    %c0_29 = arith.constant 0 : index
    %61 = memref.load %arg2[%c0_29] : memref<1xi32, #tpu.memory_space<smem>>
    %c1_i32 = arith.constant 1 : i32
    %62 = arith.muli %arg0, %c1_i32 : i32
    %63 = arith.addi %62, %arg1 : i32
    %c8192_i32 = arith.constant 8192 : i32
    %64 = arith.muli %63, %c8192_i32 : i32
    %c8192_i32_30 = arith.constant 8192 : i32
    %65 = arith.addi %64, %c8192_i32_30 : i32
    %66 = arith.cmpi sle, %65, %61 : i32
    %67 = arith.extui %66 : i1 to i32
    %c0_i32_31 = arith.constant 0 : i32
    %68 = arith.cmpi ne, %67, %c0_i32_31 : i32
    scf.if %68 {
      %c0_36 = arith.constant 0 : index
      %c0_37 = arith.constant 0 : index
      %76 = vector.load %arg5[%c0_36, %c0_37] : memref<8x1024xf32, #tpu.memory_space<vmem>>, vector<8x1024xf32>
      %77 = arith.addf %76, %60 : vector<8x1024xf32>
      %c0_38 = arith.constant 0 : index
      %c0_39 = arith.constant 0 : index
      %78 = vector.load %arg5[%c0_38, %c0_39] : memref<8x1024xf32, #tpu.memory_space<vmem>>, vector<8x1024xf32>
      tpu.vector_store %arg5[%c0_38, %c0_39], %77 {strides = array<i32>} : memref<8x1024xf32, #tpu.memory_space<vmem>>, vector<8x1024xf32>,
    } else {
    }
    %c8192_i32_32 = arith.constant 8192 : i32
    %69 = arith.addi %64, %c8192_i32_32 : i32
    %70 = arith.cmpi sgt, %69, %61 : i32
    %71 = arith.extui %70 : i1 to i32
    %c0_i32_33 = arith.constant 0 : i32
    %72 = arith.cmpi ne, %71, %c0_i32_33 : i32
    scf.if %72 {
      %76 = tpu.iota {dimensions = array<i32: 0>} : vector<8x1024xi32>
      %77 = tpu.iota {dimensions = array<i32: 1>} : vector<8x1024xi32>
      %c1024_i32 = arith.constant 1024 : i32
      %78 = vector.broadcast %c1024_i32 : i32 to vector<8x1024xi32>
      %79 = arith.muli %76, %78 : vector<8x1024xi32>
      %80 = vector.broadcast %64 : i32 to vector<8x1024xi32>
      %81 = arith.addi %80, %79 : vector<8x1024xi32>
      %82 = arith.addi %81, %77 : vector<8x1024xi32>
      %c0_36 = arith.constant 0 : index
      %c0_37 = arith.constant 0 : index
      %83 = vector.load %arg5[%c0_36, %c0_37] : memref<8x1024xf32, #tpu.memory_space<vmem>>, vector<8x1024xf32>
      %84 = vector.broadcast %61 : i32 to vector<8x1024xi32>
      %85 = arith.cmpi slt, %82, %84 : vector<8x1024xi32>
      %cst_38 = arith.constant 0.000000e+00 : f32
      %86 = vector.broadcast %cst_38 : f32 to vector<8x1024xf32>
      %87 = arith.select %85, %60, %86 : vector<8x1024xi1>, vector<8x1024xf32>
      %88 = arith.addf %83, %87 : vector<8x1024xf32>
      %c0_39 = arith.constant 0 : index
      %c0_40 = arith.constant 0 : index
      %89 = vector.load %arg5[%c0_39, %c0_40] : memref<8x1024xf32, #tpu.memory_space<vmem>>, vector<8x1024xf32>
      tpu.vector_store %arg5[%c0_39, %c0_40], %88 {strides = array<i32>} : memref<8x1024xf32, #tpu.memory_space<vmem>>, vector<8x1024xf32>,
    } else {
    }
    %c0_i32_34 = arith.constant 0 : i32
    %73 = arith.cmpi eq, %arg1, %c0_i32_34 : i32
    %74 = arith.extui %73 : i1 to i32
    %c0_i32_35 = arith.constant 0 : i32
    %75 = arith.cmpi ne, %74, %c0_i32_35 : i32
    scf.if %75 {
      %c0_36 = arith.constant 0 : index
      %c0_37 = arith.constant 0 : index
      %76 = vector.load %arg5[%c0_36, %c0_37] : memref<8x1024xf32, #tpu.memory_space<vmem>>, vector<8x1024xf32>
      %77 = vector.shape_cast %76 : vector<8x1024xf32> to vector<1x8x1024xf32>
      %cst_38 = arith.constant dense<0.000000e+00> : vector<1xf32>
      %78 = vector.multi_reduction <add>, %77, %cst_38 [1, 2] : vector<1x8x1024xf32> to vector<1xf32>
      %79 = vector.shape_cast %78 : vector<1xf32> to vector<1x1x1xf32>
      %80 = vector.extract %79[0, 0, 0] : f32 from vector<1x1x1xf32>
      %81 = tpu.iota {dimensions = array<i32: 1>} : vector<1x128xi32>
      %c0_i32_39 = arith.constant 0 : i32
      %82 = vector.broadcast %c0_i32_39 : i32 to vector<1x128xi32>
      %83 = arith.cmpi eq, %81, %82 : vector<1x128xi32>
      %cst_40 = arith.constant 0.000000e+00 : f32
      %84 = vector.broadcast %80 : f32 to vector<1x128xf32>
      %85 = vector.broadcast %cst_40 : f32 to vector<1x128xf32>
      %86 = arith.select %83, %84, %85 : vector<1x128xi1>, vector<1x128xf32>
      %c0_41 = arith.constant 0 : index
      %c0_42 = arith.constant 0 : index
      %87 = vector.load %arg4[%c0_41, %c0_42] : memref<1x128xf32, #tpu.memory_space<vmem>>, vector<1x128xf32>
      tpu.vector_store %arg4[%c0_41, %c0_42], %86 {strides = array<i32>} : memref<1x128xf32, #tpu.memory_space<vmem>>, vector<1x128xf32>,
    } else {
    }
    return
  }
  func.func @transform_0(%arg0: i32, %arg1: i32, %arg2: memref<1xi32, #tpu.memory_space<smem>>) -> (i32, i32, i32) {
    %c1_i32 = arith.constant 1 : i32
    %0 = arith.muli %arg0, %c1_i32 : i32
    %1 = arith.addi %0, %arg1 : i32
    %c0_i32 = arith.constant 0 : i32
    %c0_i32_0 = arith.constant 0 : i32
    %c0_i32_1 = arith.constant 0 : i32
    return %c0_i32, %1, %c0_i32_0 : i32, i32, i32
  }
  func.func @transform_1(%arg0: i32, %arg1: i32, %arg2: memref<1xi32, #tpu.memory_space<smem>>) -> (i32, i32) {
    %c0_i32 = arith.constant 0 : i32
    %c0_i32_0 = arith.constant 0 : i32
    return %c0_i32, %arg0 : i32, i32
  }
}

</mosaic_0001>

<bundles_post_ra>
// kernel: tpu_custom_call.1
= control target key start
LH: loop header
LB: loop body
LE: loop exit
PB: predicated region body
PF: predicated region fallthrough
CT: control target
= control target key end

     0   :  { %8 = vsyncpa [#allocation6], 0  ;;  %s1503_s0 = inlined_call_operand.<no memory space> [shape: s32[1], index: 0, kind: input, shape index: {}]   ;;  %s1504_s1 = inlined_call_operand.hbm [shape: f32[12,8,1024], index: 1, kind: input, shape index: {}]   ;;  %s1505_s2 = inlined_call_operand.hbm [shape: f32[1,128], index: 2, kind: output, shape index: {}]  }
   0x1   :  { %9 = vsyncpa [#allocation7], 0  ;;  %s18_s11 = sshll.u32 %s1504_s1, 4  ;;  %s723_s12 = smov [#allocation5]   ;;  %s19_s11 = int_to_ptr.hbm [resolvable:$true] %s18_s11 }
   0x2   :  { %s20_s13 = sshll.u32 %s723_s12, 4  ;;  %s724_s14 = smov 1024   ;;  %s21_s13 = int_to_ptr.vmem [resolvable:$true] %s20_s13 }
   0x3   :  { %s725_s15 = smov 64  }
   0x4   :  { %26 = dma.hbm_to_vmem [thread:$0]  %s19_s11, 12288, %s21_s13, [#allocation6], %s724_s14, %s724_s14, %s725_s15  }
   0x5   :  { %719 = dma.done.wait [#allocation6], 12288  }
   0x6   :  { %720 = vsyncadd [#allocation6], 4294955008  ;;  %v746_v0 = vld [vmem:[#allocation5] sm:$0xff]  ;;  %v748_v1 = vld [vmem:[#allocation5 + $0x8] sm:$0xff]  ;;  %p645_p0 = scmp.lt.s32.totalorder %s1503_s0, 8192 }
   0x7   :  { %v750_v2 = vld [vmem:[#allocation5 + $0x10] sm:$0xff]  ;;  %v752_v3 = vld [vmem:[#allocation5 + $0x18] sm:$0xff]  ;;  %v754_v4 = vld [vmem:[#allocation5 + $0x20] sm:$0xff] }
   0x8   :  { %v756_v5 = vld [vmem:[#allocation5 + $0x28] sm:$0xff]  ;;  %v758_v6 = vld [vmem:[#allocation5 + $0x30] sm:$0xff]  ;;  %v760_v7 = vld [vmem:[#allocation5 + $0x40] sm:$0xff] }
   0x9   :  { %1560 = vst [vmem:[#allocation11_spill] sm:$0xff] %v760_v7  ;;  %v762_v8 = vld [vmem:[#allocation5 + $0xc0] sm:$0xff]  ;;  %v764_v9 = vld [vmem:[#allocation5 + $0xc8] sm:$0xff]  ;;  %v766_v10 = vld [vmem:[#allocation5 + $0xd0] sm:$0xff] }
   0xa   :  { %v768_v11 = vld [vmem:[#allocation5 + $0x38] sm:$0xff]  ;;  %v770_v12 = vld [vmem:[#allocation5 + $0x48] sm:$0xff]  ;;  %v772_v13 = vld [vmem:[#allocation5 + $0x50] sm:$0xff]  ;;  %v151_v18 = vsub.f32 %v762_v8, %v746_v0  ;;  %v152_v25 = vsub.f32 %v764_v9, %v748_v1  ;;  %v153_v26 = vsub.f32 %v766_v10, %v750_v2 }
   0xb   :  { %1561 = vst [vmem:[#allocation12_spill] sm:$0xff] %v768_v11  ;;  %v774_v14 = vld [vmem:[#allocation5 + $0x58] sm:$0xff]  ;;  %v778_v16 = vld [vmem:[#allocation5 + $0xe0] sm:$0xff]  ;;  %v780_v17 = vld [vmem:[#allocation5 + $0xe8] sm:$0xff] }
   0xc   :  { %1562 = vst [vmem:[#allocation13_spill] sm:$0xff] %v770_v12  ;;  %v776_v15 = vld [vmem:[#allocation5 + $0xd8] sm:$0xff]  ;;  %v784_v19 = vld [vmem:[#allocation5 + $0x60] sm:$0xff]  ;;  %v786_v20 = vld [vmem:[#allocation5 + $0x68] sm:$0xff]  ;;  %v155_v32 = vsub.f32 %v778_v16, %v754_v4  ;;  %v156_v33 = vsub.f32 %v780_v17, %v756_v5 }
   0xd   :  { %1563 = vst [vmem:[#allocation14_spill] sm:$0xff] %v772_v13  ;;  %v788_v21 = vld [vmem:[#allocation5 + $0x70] sm:$0xff]  ;;  %v792_v23 = vld [vmem:[#allocation5 + $0xf8] sm:$0xff]  ;;  %v794_v24 = vld [vmem:[#allocation5 + $0x100] sm:$0xff]  ;;  %v154_v27 = vsub.f32 %v776_v15, %v752_v3 }
   0xe   :  { %1564 = vst [vmem:[#allocation15_spill] sm:$0xff] %v774_v14  ;;  %v790_v22 = vld [vmem:[#allocation5 + $0xf0] sm:$0xff]  ;;  %v802_v28 = vld [vmem:[#allocation5 + $0x78] sm:$0xff]  ;;  %v804_v29 = vld [vmem:[#allocation5 + $0x108] sm:$0xff]  ;;  %v159_v35 = vsub.f32 %v794_v24, %v760_v7  ;;  %v158_v40 = vsub.f32 %v792_v23, %v768_v11 }
   0xf   :  { %1565 = vst [vmem:[#allocation16_spill] sm:$0xff] %v784_v19  ;;  %v806_v30 = vld [vmem:[#allocation5 + $0x110] sm:$0xff]  ;;  %v808_v31 = vld [vmem:[#allocation5 + $0x118] sm:$0xff]  ;;  %v157_v34 = vsub.f32 %v790_v22, %v758_v6  ;;  %v818_v36 = vld [vmem:[#allocation5 + $0x80] sm:$0xff]  ;;  %v160_v41 = vsub.f32 %v804_v29, %v770_v12 }
  0x10   :  { %1566 = vst [vmem:[#allocation17_spill] sm:$0xff] %v786_v20  ;;  %v820_v37 = vld [vmem:[#allocation5 + $0x120] sm:$0xff]  ;;  %v822_v38 = vld [vmem:[#allocation5 + $0x128] sm:$0xff]  ;;  %v824_v39 = vld [vmem:[#allocation5 + $0x130] sm:$0xff]  ;;  %v161_v42 = vsub.f32 %v806_v30, %v772_v13  ;;  %v162_v43 = vsub.f32 %v808_v31, %v774_v14  ;;  %v167_v53 = vmul.f32 %v159_v35, %v151_v18 }
  0x11   :  { %1567 = vst [vmem:[#allocation18_spill] sm:$0xff] %v788_v21  ;;  %v834_v44 = vld [vmem:[#allocation5 + $0x88] sm:$0xff]  ;;  %v836_v45 = vld [vmem:[#allocation5 + $0x90] sm:$0xff]  ;;  %v838_v46 = vld [vmem:[#allocation5 + $0x98] sm:$0xff]  ;;  %v163_v50 = vsub.f32 %v820_v37, %v784_v19  ;;  %v164_v51 = vsub.f32 %v822_v38, %v786_v20  ;;  %v165_v52 = vsub.f32 %v824_v39, %v788_v21  ;;  %v168_v62 = vmul.f32 %v160_v41, %v152_v25 }
  0x12   :  { %1568 = vst [vmem:[#allocation19_spill] sm:$0xff] %v792_v23  ;;  %v840_v47 = vld [vmem:[#allocation5 + $0x138] sm:$0xff]  ;;  %v842_v48 = vld [vmem:[#allocation5 + $0x140] sm:$0xff]  ;;  %v844_v49 = vld [vmem:[#allocation5 + $0x148] sm:$0xff]  ;;  %v169_v63 = vmul.f32 %v161_v42, %v153_v26  ;;  %v170_v18 = vmul.f32 %v162_v43, %v154_v27 }
  0x13   :  { %1569 = vst [vmem:[#allocation20_spill] sm:$0xff] %v794_v24  ;;  %v852_v54 = vld [vmem:[#allocation5 + $0xa0] sm:$0xff]  ;;  %v854_v55 = vld [vmem:[#allocation5 + $0xa8] sm:$0xff]  ;;  %v856_v56 = vld [vmem:[#allocation5 + $0xb0] sm:$0xff]  ;;  %v166_v61 = vsub.f32 %v840_v47, %v802_v28  ;;  %v176_v26 = vsub.f32 %v844_v49, %v834_v44 }
  0x14   :  { %1570 = vst [vmem:[#allocation21_spill] sm:$0xff] %v802_v28  ;;  %v858_v57 = vld [vmem:[#allocation5 + $0xb8] sm:$0xff]  ;;  %v860_v58 = vld [vmem:[#allocation5 + $0x150] sm:$0xff]  ;;  %v864_v60 = vld [vmem:[#allocation5 + $0x160] sm:$0xff] }
  0x15   :  { %1571 = vst [vmem:[#allocation22_spill] sm:$0xff] %v804_v29  ;;  %v862_v59 = vld [vmem:[#allocation5 + $0x158] sm:$0xff]  ;;  %v868_v35 = vld [vmem:[#allocation5 + $0x168] sm:$0xff]  ;;  %v175_v29 = vsub.f32 %v842_v48, %v818_v36  ;;  %v876_v24 = vld [vmem:[#allocation5 + $0x180] sm:$0xff]  ;;  %v174_v25 = vmul.f32 %v166_v61, %v158_v40  ;;  %v177_v27 = vsub.f32 %v860_v58, %v836_v45  ;;  %v179_v42 = vsub.f32 %v864_v60, %v852_v54 }
  0x16   :  { %1572 = vst [vmem:[#allocation23_spill] sm:$0xff] %v806_v30  ;;  %v173_v30 = vmul.f32 %v165_v52, %v157_v34  ;;  %v878_v23 = vld [vmem:[#allocation5 + $0x188] sm:$0xff]  ;;  %v890_v34 = vld [vmem:[#allocation5 + $0x1a0] sm:$0xff]  ;;  %v180_v40 = vsub.f32 %v868_v35, %v854_v55  ;;  %v904_v52 = vld [vmem:[#allocation5 + $0x1b8] sm:$0xff] }
  0x17   :  { %1573 = vst [vmem:[#allocation24_spill] sm:$0xff] %v808_v31  ;;  %v172_v31 = vmul.f32 %v164_v51, %v156_v33  ;;  %v888_v33 = vld [vmem:[#allocation5 + $0x198] sm:$0xff]  ;;  %v892_v41 = vld [vmem:[#allocation5 + $0x1a8] sm:$0xff]  ;;  %v902_v51 = vld [vmem:[#allocation5 + $0x1b0] sm:$0xff] }
  0x18   :  { %1574 = vst [vmem:[#allocation25_spill] sm:$0xff] %v818_v36  ;;  %v906_v61 = vld [vmem:[#allocation5 + $0x1c0] sm:$0xff]  ;;  %v1024_v36 = vld [vmem:[#allocation5 + $0x298] sm:$0xff]  ;;  %v1078_v11 = vld [vmem:[#allocation5 + $0x2e8] sm:$0xff] }
  0x19   :  { %1575 = vst [vmem:[#allocation26_spill] sm:$0xff] %v820_v37  ;;  %v171_v37 = vmul.f32 %v163_v50, %v155_v32  ;;  %v178_v32 = vsub.f32 %v862_v59, %v838_v46  ;;  %v1034_v20 = vld [vmem:[#allocation5 + $0x2a0] sm:$0xff] }
  0x1a   :  { %1576 = vst [vmem:[#allocation27_spill] sm:$0xff] %v822_v38  ;;  %v872_v38 = vld [vmem:[#allocation5 + $0x178] sm:$0xff] }
  0x1b   :  { %1577 = vst [vmem:[#allocation28_spill] sm:$0xff] %v824_v39  ;;  %v870_v39 = vld [vmem:[#allocation5 + $0x170] sm:$0xff]  ;;  %v182_v50 = vsub.f32 %v872_v38, %v858_v57 }
  0x1c   :  { %1578 = vst [vmem:[#allocation29_spill] sm:$0xff] %v834_v44  ;;  %v181_v43 = vsub.f32 %v870_v39, %v856_v56  ;;  %v1020_v44 = vld [vmem:[#allocation5 + $0x288] sm:$0xff] }
  0x1d   :  { %1579 = vst [vmem:[#allocation30_spill] sm:$0xff] %v836_v45 }
  0x1e   :  { %1580 = vst [vmem:[#allocation31_spill] sm:$0xff] %v838_v46 }
  0x1f   :  { %1581 = vst [vmem:[#allocation32_spill] sm:$0xff] %v840_v47  ;;  %v880_v47 = vld [vmem:[#allocation5 + $0x190] sm:$0xff] }
  0x20   :  { %1582 = vst [vmem:[#allocation33_spill] sm:$0xff] %v842_v48 }
  0x21   :  { %1583 = vst [vmem:[#allocation34_spill] sm:$0xff] %v844_v49 }
  0x22   :  { %1584 = vst [vmem:[#allocation35_spill] sm:$0xff] %v852_v54  ;;  %v912_v54 = vmul.f32 %v177_v27, %v169_v63  ;;  %v934_v63 = vld [vmem:[#allocation5 + $0x1f0] sm:$0xff]  ;;  %v948_v27 = vld [vmem:[#allocation5 + $0x208] sm:$0xff] }
  0x23   :  { %1585 = vst [vmem:[#allocation36_spill] sm:$0xff] %v854_v55  ;;  %v916_v55 = vld [vmem:[#allocation5 + $0x1c8] sm:$0xff] }
  0x24   :  { %1586 = vst [vmem:[#allocation37_spill] sm:$0xff] %v856_v56  ;;  %v918_v56 = vld [vmem:[#allocation5 + $0x1d0] sm:$0xff]  ;;  %v200_v19 = vsub.f32 %v1020_v44, %v916_v55 }
  0x25   :  { %1587 = vst [vmem:[#allocation38_spill] sm:$0xff] %v858_v57  ;;  %v922_v57 = vmul.f32 %v179_v42, %v171_v37  ;;  %v944_v37 = vld [vmem:[#allocation5 + $0x1f8] sm:$0xff] }
  0x26   :  { %1588 = vst [vmem:[#allocation39_spill] sm:$0xff] %v860_v58  ;;  %v910_v58 = vmul.f32 %v176_v26, %v168_v62  ;;  %v932_v62 = vld [vmem:[#allocation5 + $0x1e8] sm:$0xff] }
  0x27   :  { %1589 = vst [vmem:[#allocation40_spill] sm:$0xff] %v862_v59  ;;  %v908_v59 = vmul.f32 %v175_v29, %v167_v53  ;;  %v928_v29 = vmul.f32 %v182_v50, %v174_v25  ;;  %v930_v53 = vld [vmem:[#allocation5 + $0x1e0] sm:$0xff]  ;;  %v958_v50 = vld [vmem:[#allocation5 + $0x210] sm:$0xff]  ;;  %v980_v26 = vld [vmem:[#allocation5 + $0x248] sm:$0xff] }
  0x28   :  { %1590 = vst [vmem:[#allocation41_spill] sm:$0xff] %v864_v60  ;;  %v914_v60 = vmul.f32 %v178_v32, %v170_v18  ;;  %v946_v25 = vld [vmem:[#allocation5 + $0x200] sm:$0xff]  ;;  %v982_v32 = vld [vmem:[#allocation5 + $0x250] sm:$0xff]  ;;  %v192_v42 = vsub.f32 %v980_v26, %v878_v23  ;;  %v1008_v18 = vld [vmem:[#allocation5 + $0x278] sm:$0xff]  ;;  %v232_v45 = vmin.f32 %v764_v9, %v980_v26 }
  0x29   :  { %1591 = vst [vmem:[#allocation42_spill] sm:$0xff] %v868_v35  ;;  %v926_v35 = vmul.f32 %v181_v43, %v173_v30  ;;  %v960_v30 = vld [vmem:[#allocation5 + $0x218] sm:$0xff]  ;;  %v1022_v43 = vld [vmem:[#allocation5 + $0x290] sm:$0xff]  ;;  %v198_v48 = vsub.f32 %v1008_v18, %v904_v52  ;;  %v233_v21 = vmin.f32 %v766_v10, %v982_v32  ;;  %v1036_v9 = vld [vmem:[#allocation5 + $0x2a8] sm:$0xff]  ;;  %v203_v10 = vsub.f32 %v1034_v20, %v930_v53 }
  0x2a   :  { %1592 = vst [vmem:[#allocation43_spill] sm:$0xff] %v870_v39  ;;  %v920_v39 = vld [vmem:[#allocation5 + $0x1d8] sm:$0xff]  ;;  %v1038_v26 = vld [vmem:[#allocation5 + $0x2b0] sm:$0xff]  ;;  %v201_v14 = vsub.f32 %v1022_v43, %v918_v56 }
  0x2b   :  { %1593 = vst [vmem:[#allocation44_spill] sm:$0xff] %v872_v38  ;;  %v924_v38 = vmul.f32 %v180_v40, %v172_v31  ;;  %v994_v31 = vld [vmem:[#allocation5 + $0x260] sm:$0xff]  ;;  %v193_v40 = vsub.f32 %v982_v32, %v880_v47  ;;  %v202_v13 = vsub.f32 %v1024_v36, %v920_v39  ;;  %v204_v32 = vsub.f32 %v1036_v9, %v932_v62 }
  0x2c   :  { %1594 = vst [vmem:[#allocation45_spill] sm:$0xff] %v902_v51 }
  0x2d   :  { %1595 = vst [vmem:[#allocation46_spill] sm:$0xff] %v904_v52 }
  0x2e   :  { %1596 = vst [vmem:[#allocation47_spill] sm:$0xff] %v906_v61 }
  0x2f   :  { %1597 = vst [vmem:[#allocation48_spill] sm:$0xff] %v908_v59  ;;  %v195_v59 = vsub.f32 %v994_v31, %v890_v34 }
  0x30   :  { %1598 = vst [vmem:[#allocation49_spill] sm:$0xff] %v910_v58 }
  0x31   :  { %1599 = vst [vmem:[#allocation50_spill] sm:$0xff] %v912_v54  ;;  %v1010_v54 = vld [vmem:[#allocation5 + $0x280] sm:$0xff] }
  0x32   :  { %1600 = vst [vmem:[#allocation51_spill] sm:$0xff] %v914_v60  ;;  %v1006_v60 = vld [vmem:[#allocation5 + $0x270] sm:$0xff]  ;;  %v199_v28 = vsub.f32 %v1010_v54, %v906_v61  ;;  %v1048_v61 = vld [vmem:[#allocation5 + $0x2b8] sm:$0xff] }
  0x33   :  { %1601 = vst [vmem:[#allocation52_spill] sm:$0xff] %v916_v55  ;;  %v197_v49 = vsub.f32 %v1006_v60, %v902_v51  ;;  %v205_v55 = vsub.f32 %v1038_v26, %v934_v63  ;;  %v1080_v51 = vld [vmem:[#allocation5 + $0x2f0] sm:$0xff] }
  0x34   :  { %1602 = vst [vmem:[#allocation53_spill] sm:$0xff] %v918_v56  ;;  %v1058_v56 = vld [vmem:[#allocation5 + $0x228] sm:$0xff] }
  0x35   :  { %1603 = vst [vmem:[#allocation54_spill] sm:$0xff] %v920_v39  ;;  %v1060_v39 = vld [vmem:[#allocation5 + $0x230] sm:$0xff] }
  0x36   :  { %1604 = vst [vmem:[#allocation55_spill] sm:$0xff] %v922_v57 }
  0x37   :  { %1605 = vst [vmem:[#allocation56_spill] sm:$0xff] %v924_v38  ;;  %v996_v38 = vld [vmem:[#allocation5 + $0x268] sm:$0xff] }
  0x38   :  { %1606 = vst [vmem:[#allocation57_spill] sm:$0xff] %v926_v35  ;;  %v992_v35 = vld [vmem:[#allocation5 + $0x258] sm:$0xff]  ;;  %v196_v46 = vsub.f32 %v996_v38, %v892_v41 }
  0x39   :  { %1607 = vst [vmem:[#allocation58_spill] sm:$0xff] %v928_v29  ;;  %v978_v29 = vld [vmem:[#allocation5 + $0x240] sm:$0xff]  ;;  %v194_v58 = vsub.f32 %v992_v35, %v888_v33  ;;  %v234_v12 = vmin.f32 %v776_v15, %v992_v35  ;;  %v1066_v35 = vld [vmem:[#allocation5 + $0x2c8] sm:$0xff] }
  0x3a   :  { %1608 = vst [vmem:[#allocation59_spill] sm:$0xff] %v930_v53  ;;  %v191_v57 = vsub.f32 %v978_v29, %v876_v24  ;;  %v1064_v15 = vld [vmem:[#allocation5 + $0x2c0] sm:$0xff]  ;;  %v206_v53 = vsub.f32 %v1048_v61, %v944_v37 }
  0x3b   :  { %1609 = vst [vmem:[#allocation60_spill] sm:$0xff] %v932_v62  ;;  %v208_v62 = vmul.f32 %v200_v19, %v192_v42  ;;  %v215_v52 = vsub.f32 %v1064_v15, %v946_v25 }
  0x3c   :  { %1610 = vst [vmem:[#allocation61_spill] sm:$0xff] %v934_v63  ;;  %v207_v7 = vmul.f32 %v199_v28, %v191_v57  ;;  %v1070_v63 = vld [vmem:[#allocation5 + $0x2d0] sm:$0xff]  ;;  %v1072_v28 = vld [vmem:[#allocation5 + $0x2d8] sm:$0xff]  ;;  %v1074_v57 = vld [vmem:[#allocation5 + $0x2e0] sm:$0xff] }
  0x3d   :  { %1611 = vst [vmem:[#allocation62_spill] sm:$0xff] %v944_v37  ;;  %v1082_v37 = vld [vmem:[#allocation5 + $0x2f8] sm:$0xff]  ;;  %v217_v19 = vsub.f32 %v1070_v63, %v958_v50 }
  0x3e   :  { %1612 = vst [vmem:[#allocation63_spill] sm:$0xff] %v948_v27 }
  0x3f   :  { %1613 = vst [vmem:[#allocation64_spill] sm:$0xff] %v958_v50 }
  0x40   :  { %1614 = vst [vmem:[#allocation65_spill] sm:$0xff] %v960_v30 }
  0x41   :  { %1615 = vst [vmem:[#allocation66_spill] sm:$0xff] %v1010_v54  ;;  %v213_v54 = vmul.f32 %v205_v55, %v197_v49  ;;  %v220_v55 = vsub.f32 %v1078_v11, %v1058_v56 }
  0x42   :  { %1616 = vst [vmem:[#allocation67_spill] sm:$0xff] %v1020_v44  ;;  %v1056_v44 = vld [vmem:[#allocation5 + $0x220] sm:$0xff] }
  0x43   :  { %1617 = vst [vmem:[#allocation68_spill] sm:$0xff] %v1022_v43  ;;  %v212_v43 = vmul.f32 %v204_v32, %v196_v46  ;;  %v218_v46 = vsub.f32 %v1072_v28, %v960_v30  ;;  %v219_v49 = vsub.f32 %v1074_v57, %v1056_v44 }
  0x44   :  { %1618 = vst [vmem:[#allocation69_spill] sm:$0xff] %v1024_v36  ;;  %v1062_v36 = vld [vmem:[#allocation5 + $0x238] sm:$0xff] }
  0x45   :  { %1619 = vst [vmem:[#allocation70_spill] sm:$0xff] %v1034_v20  ;;  %v210_v20 = vmul.f32 %v202_v13, %v194_v58  ;;  %v216_v13 = vsub.f32 %v1066_v35, %v948_v27  ;;  %v221_v58 = vsub.f32 %v1080_v51, %v1060_v39  ;;  %v1108_v32 = vmul.f32 %v220_v55, %v212_v43  ;;  %v1640_v55 = vld [vmem:[#allocation23_spill] sm:$0xff] }
  0x46   :  { %1620 = vst [vmem:[#allocation71_spill] sm:$0xff] %v1036_v9  ;;  %v209_v9 = vmul.f32 %v201_v14, %v193_v40  ;;  %v214_v14 = vmul.f32 %v206_v53, %v198_v48  ;;  %v222_v48 = vsub.f32 %v1082_v37, %v1062_v36  ;;  %v235_v27 = vmin.f32 %v778_v16, %v994_v31 }
  0x47   :  { %1621 = vst [vmem:[#allocation72_spill] sm:$0xff] %v1038_v26  ;;  %v211_v26 = vmul.f32 %v203_v10, %v195_v59  ;;  %v1098_v59 = vmul.f32 %v215_v52, %v207_v7  ;;  %v1100_v53 = vmul.f32 %v216_v13, %v208_v62  ;;  %v1104_v40 = vmul.f32 %v218_v46, %v210_v20  ;;  %v1622_v20 = vld [vmem:[#allocation19_spill] sm:$0xff] }
  0x48   :  { %v1102_v42 = vmul.f32 %v217_v19, %v209_v9  ;;  %v1110_v30 = vmul.f32 %v221_v58, %v213_v54  ;;  %v1112_v50 = vmul.f32 %v222_v48, %v214_v14  ;;  %v236_v7 = vmin.f32 %v780_v17, %v996_v38  ;;  %v1638_v19 = vld [vmem:[#allocation22_spill] sm:$0xff] }
  0x49   :  { %v1106_v10 = vmul.f32 %v219_v49, %v211_v26  ;;  %v237_v52 = vmin.f32 %v790_v22, %v1006_v60  ;;  %v238_v62 = vmin.f32 %v1622_v20, %v1008_v18  ;;  %v1623_v43 = vmax.f32 %v746_v0, %v876_v24  ;;  %v1630_v24 = vld [vmem:[#allocation45_spill] sm:$0xff]  ;;  %v1636_v26 = vld [vmem:[#allocation20_spill] sm:$0xff]  ;;  %v1637_v13 = vld [vmem:[#allocation67_spill] sm:$0xff] }
  0x4a   :  { %v1624_v54 = vmin.f32 %v762_v8, %v978_v29  ;;  %v1625_v16 = vmax.f32 %v748_v1, %v878_v23  ;;  %v1626_v17 = vmax.f32 %v750_v2, %v880_v47  ;;  %v1627_v38 = vmax.f32 %v752_v3, %v888_v33  ;;  %v1633_v47 = vld [vmem:[#allocation46_spill] sm:$0xff]  ;;  %v1639_v49 = vld [vmem:[#allocation68_spill] sm:$0xff] }
  0x4b   :  { %v1628_v0 = vmax.f32 %v754_v4, %v890_v34  ;;  %v1629_v1 = vmax.f32 %v756_v5, %v892_v41  ;;  %v1631_v2 = vmax.f32 %v758_v6, %v1630_v24  ;;  %v264_v46 = vmin.f32 %v1638_v19, %v1637_v13  ;;  %v1641_v48 = vld [vmem:[#allocation69_spill] sm:$0xff]  ;;  %v1660_v13 = vld [vmem:[#allocation54_spill] sm:$0xff] }
  0x4c   :  { %v1128_v9 = vsub.f32 %v1624_v54, %v1623_v43  ;;  %v1133_v31 = vsub.f32 %v232_v45, %v1625_v16  ;;  %v1138_v22 = vsub.f32 %v233_v21, %v1626_v17  ;;  %v1143_v60 = vsub.f32 %v234_v12, %v1627_v38  ;;  %v1632_v45 = vld [vmem:[#allocation12_spill] sm:$0xff]  ;;  %v1643_v20 = vld [vmem:[#allocation70_spill] sm:$0xff]  ;;  %v1653_v24 = vld [vmem:[#allocation13_spill] sm:$0xff] }
  0x4d   :  { %v1148_v8 = vsub.f32 %v235_v27, %v1628_v0  ;;  %v1153_v23 = vsub.f32 %v236_v7, %v1629_v1  ;;  %v1158_v21 = vsub.f32 %v237_v52, %v1631_v2  ;;  %v1634_v3 = vmax.f32 %v1632_v45, %v1633_v47  ;;  %v1635_v27 = vld [vmem:[#allocation66_spill] sm:$0xff]  ;;  %v1642_v7 = vld [vmem:[#allocation24_spill] sm:$0xff]  ;;  %v1645_v54 = vld [vmem:[#allocation71_spill] sm:$0xff] }
  0x4e   :  { %v255_v33 = vmax.f32 %v1128_v9, 0.0  ;;  %v256_v4 = vmax.f32 %v1133_v31, 0.0  ;;  %v257_v34 = vmax.f32 %v1138_v22, 0.0  ;;  %v258_v5 = vmax.f32 %v1143_v60, 0.0  ;;  %v1646_v9 = vld [vmem:[#allocation27_spill] sm:$0xff]  ;;  %v1647_v31 = vld [vmem:[#allocation72_spill] sm:$0xff] }
  0x4f   :  { %v1163_v12 = vsub.f32 %v238_v62, %v1634_v3  ;;  %v259_v41 = vmax.f32 %v1148_v8, 0.0  ;;  %v260_v29 = vmax.f32 %v1153_v23, 0.0  ;;  %v261_v6 = vmax.f32 %v1158_v21, 0.0  ;;  %v1644_v62 = vld [vmem:[#allocation26_spill] sm:$0xff]  ;;  %v1648_v17 = vld [vmem:[#allocation28_spill] sm:$0xff]  ;;  %v1650_v0 = vld [vmem:[#allocation11_spill] sm:$0xff] }
  0x50   :  { %v263_v14 = vmin.f32 %v1636_v26, %v1635_v27  ;;  %v265_v58 = vmin.f32 %v1640_v55, %v1639_v49  ;;  %v266_v52 = vmin.f32 %v1642_v7, %v1641_v48  ;;  %v267_v43 = vmin.f32 %v1644_v62, %v1643_v20  ;;  %v1649_v38 = vld [vmem:[#allocation32_spill] sm:$0xff]  ;;  %v1651_v8 = vld [vmem:[#allocation47_spill] sm:$0xff]  ;;  %v1656_v47 = vld [vmem:[#allocation14_spill] sm:$0xff] }
  0x51   :  { %v262_v18 = vmax.f32 %v1163_v12, 0.0  ;;  %v268_v16 = vmin.f32 %v1646_v9, %v1645_v54  ;;  %v269_v22 = vmin.f32 %v1648_v17, %v1647_v31  ;;  %v270_v60 = vmin.f32 %v1649_v38, %v1048_v61  ;;  %v1654_v2 = vld [vmem:[#allocation52_spill] sm:$0xff]  ;;  %v1657_v3 = vld [vmem:[#allocation53_spill] sm:$0xff]  ;;  %v1659_v26 = vld [vmem:[#allocation15_spill] sm:$0xff] }
  0x52   :  { %v1652_v1 = vmax.f32 %v1650_v0, %v1651_v8  ;;  %v1655_v21 = vmax.f32 %v1653_v24, %v1654_v2  ;;  %v1658_v12 = vmax.f32 %v1656_v47, %v1657_v3  ;;  %v1661_v19 = vmax.f32 %v1659_v26, %v1660_v13  ;;  %v1662_v55 = vld [vmem:[#allocation16_spill] sm:$0xff]  ;;  %v1663_v48 = vld [vmem:[#allocation59_spill] sm:$0xff]  ;;  %v1665_v20 = vld [vmem:[#allocation17_spill] sm:$0xff] }
  0x53   :  { %v1664_v7 = vmax.f32 %v1662_v55, %v1663_v48  ;;  %v1666_v62 = vld [vmem:[#allocation60_spill] sm:$0xff]  ;;  %v1668_v9 = vld [vmem:[#allocation18_spill] sm:$0xff]  ;;  %v1669_v31 = vld [vmem:[#allocation61_spill] sm:$0xff] }
  0x54   :  { %v279_v23 = vsub.f32 %v263_v14, %v1652_v1  ;;  %v280_v45 = vsub.f32 %v264_v46, %v1655_v21  ;;  %v281_v27 = vsub.f32 %v265_v58, %v1658_v12  ;;  %v282_v49 = vsub.f32 %v266_v52, %v1661_v19  ;;  %v1671_v38 = vld [vmem:[#allocation21_spill] sm:$0xff]  ;;  %v1672_v0 = vld [vmem:[#allocation62_spill] sm:$0xff]  ;;  %v1677_v55 = vld [vmem:[#allocation40_spill] sm:$0xff] }
  0x55   :  { %v283_v61 = vsub.f32 %v267_v43, %v1664_v7  ;;  %v1667_v54 = vmax.f32 %v1665_v20, %v1666_v62  ;;  %v1670_v17 = vmax.f32 %v1668_v9, %v1669_v31  ;;  %v1673_v8 = vmax.f32 %v1671_v38, %v1672_v0  ;;  %v1674_v12 = vld [vmem:[#allocation33_spill] sm:$0xff]  ;;  %v1680_v48 = vld [vmem:[#allocation43_spill] sm:$0xff]  ;;  %v1691_v38 = vld [vmem:[#allocation30_spill] sm:$0xff] }
  0x56   :  { %v287_v1 = vmax.f32 %v279_v23, 0.0  ;;  %v288_v24 = vmax.f32 %v280_v45, 0.0  ;;  %v289_v2 = vmax.f32 %v281_v27, 0.0  ;;  %v290_v52 = vmax.f32 %v282_v49, 0.0  ;;  %v1678_v23 = vld [vmem:[#allocation41_spill] sm:$0xff]  ;;  %v1679_v27 = vld [vmem:[#allocation42_spill] sm:$0xff] }
  0x57   :  { %v284_v14 = vsub.f32 %v268_v16, %v1667_v54  ;;  %v285_v46 = vsub.f32 %v269_v22, %v1670_v17  ;;  %v286_v58 = vsub.f32 %v270_v60, %v1673_v8  ;;  %v291_v21 = vmax.f32 %v283_v61, 0.0  ;;  %v1675_v16 = vld [vmem:[#allocation34_spill] sm:$0xff]  ;;  %v1676_v22 = vld [vmem:[#allocation39_spill] sm:$0xff]  ;;  %v1686_v9 = vld [vmem:[#allocation25_spill] sm:$0xff] }
  0x58   :  { %v295_v26 = vmin.f32 %v1674_v12, %v1064_v15  ;;  %v296_v13 = vmin.f32 %v1675_v16, %v1066_v35  ;;  %v297_v19 = vmin.f32 %v1676_v22, %v1070_v63  ;;  %v298_v60 = vmin.f32 %v1677_v55, %v1072_v28  ;;  %v1681_v15 = vld [vmem:[#allocation44_spill] sm:$0xff]  ;;  %v1682_v35 = vld [vmem:[#allocation35_spill] sm:$0xff]  ;;  %v1684_v28 = vld [vmem:[#allocation37_spill] sm:$0xff] }
  0x59   :  { %v292_v47 = vmax.f32 %v284_v14, 0.0  ;;  %v293_v3 = vmax.f32 %v285_v46, 0.0  ;;  %v294_v43 = vmax.f32 %v286_v58, 0.0  ;;  %v299_v45 = vmin.f32 %v1678_v23, %v1074_v57  ;;  %v1683_v63 = vld [vmem:[#allocation36_spill] sm:$0xff]  ;;  %v1685_v57 = vld [vmem:[#allocation38_spill] sm:$0xff]  ;;  %v1689_v17 = vld [vmem:[#allocation63_spill] sm:$0xff] }
  0x5a   :  { %v300_v49 = vmin.f32 %v1679_v27, %v1078_v11  ;;  %v301_v7 = vmin.f32 %v1680_v48, %v1080_v51  ;;  %v302_v61 = vmin.f32 %v1681_v15, %v1082_v37  ;;  %v307_v20 = vmax.f32 %v1682_v35, %v1056_v44  ;;  %v1688_v51 = vld [vmem:[#allocation29_spill] sm:$0xff]  ;;  %v1692_v0 = vld [vmem:[#allocation64_spill] sm:$0xff]  ;;  %v1694_v58 = vld [vmem:[#allocation31_spill] sm:$0xff] }
  0x5b   :  { %v308_v62 = vmax.f32 %v1683_v63, %v1058_v56  ;;  %v309_v54 = vmax.f32 %v1684_v28, %v1060_v39  ;;  %v310_v14 = vmax.f32 %v1685_v57, %v1062_v36  ;;  %v1687_v11 = vmax.f32 %v1686_v9, %v946_v25  ;;  %v1695_v56 = vld [vmem:[#allocation65_spill] sm:$0xff] }
  0x5c   :  { %v1690_v46 = vmax.f32 %v1688_v51, %v1689_v17  ;;  %v1693_v44 = vmax.f32 %v1691_v38, %v1692_v0  ;;  %v1696_v12 = vmax.f32 %v1694_v58, %v1695_v56  ;;  %v315_v39 = vsub.f32 %v299_v45, %v307_v20 }
  0x5d   :  { %v311_v31 = vsub.f32 %v295_v26, %v1687_v11  ;;  %v316_v22 = vsub.f32 %v300_v49, %v308_v62  ;;  %v317_v55 = vsub.f32 %v301_v7, %v309_v54  ;;  %v318_v36 = vsub.f32 %v302_v61, %v310_v14  ;;  %v1704_v54 = vld [vmem:[#allocation58_spill] sm:$0xff] }
  0x5e   :  { %v312_v37 = vsub.f32 %v296_v13, %v1690_v46  ;;  %v313_v8 = vsub.f32 %v297_v19, %v1693_v44  ;;  %v314_v16 = vsub.f32 %v298_v60, %v1696_v12  ;;  %v323_v48 = vmax.f32 %v315_v39, 0.0 }
  0x5f   :  { %v319_v23 = vmax.f32 %v311_v31, 0.0  ;;  %v324_v15 = vmax.f32 %v316_v22, 0.0  ;;  %v325_v35 = vmax.f32 %v317_v55, 0.0  ;;  %v326_v13 = vmax.f32 %v318_v36, 0.0 }
  0x60   :  { %v320_v27 = vmax.f32 %v312_v37, 0.0  ;;  %v321_v25 = vmax.f32 %v313_v8, 0.0  ;;  %v322_v26 = vmax.f32 %v314_v16, 0.0  ;;  %v327_v63 = vmul.f32 %v287_v1, %v255_v33  ;;  %v1700_v1 = vld [vmem:[#allocation51_spill] sm:$0xff] }
  0x61   :  { %v328_v28 = vmul.f32 %v288_v24, %v256_v4  ;;  %v329_v57 = vmul.f32 %v289_v2, %v257_v34  ;;  %v330_v19 = vmul.f32 %v290_v52, %v258_v5  ;;  %v331_v9 = vmul.f32 %v291_v21, %v259_v41  ;;  %v1697_v34 = vld [vmem:[#allocation48_spill] sm:$0xff]  ;;  %v1698_v41 = vld [vmem:[#allocation49_spill] sm:$0xff]  ;;  %v1701_v2 = vld [vmem:[#allocation55_spill] sm:$0xff] }
  0x62   :  { %v332_v11 = vmul.f32 %v292_v47, %v260_v29  ;;  %v333_v51 = vmul.f32 %v293_v3, %v261_v6  ;;  %v334_v60 = vmul.f32 %v294_v43, %v262_v18  ;;  %v1249_v45 = vmul.f32 %v327_v63, %v319_v23  ;;  %v1699_v6 = vld [vmem:[#allocation50_spill] sm:$0xff]  ;;  %v1702_v21 = vld [vmem:[#allocation56_spill] sm:$0xff]  ;;  %v1703_v3 = vld [vmem:[#allocation57_spill] sm:$0xff] }
  0x63   :  { %v1251_v49 = vmul.f32 %v328_v28, %v320_v27  ;;  %v1253_v7 = vmul.f32 %v329_v57, %v321_v25  ;;  %v1255_v61 = vmul.f32 %v330_v19, %v322_v26  ;;  %v1257_v20 = vmul.f32 %v331_v9, %v323_v48 }
  0x64   :  { %v1259_v62 = vmul.f32 %v332_v11, %v324_v15  ;;  %v1261_v33 = vmul.f32 %v333_v51, %v325_v35  ;;  %v1263_v4 = vmul.f32 %v334_v60, %v326_v13  ;;  %v343_v5 = vadd.f32 %v1098_v59, %v1697_v34 }
  0x65   :  { %v344_v29 = vadd.f32 %v1100_v53, %v1698_v41  ;;  %v345_v18 = vadd.f32 %v1102_v42, %v1699_v6  ;;  %v346_v24 = vadd.f32 %v1104_v40, %v1700_v1  ;;  %v347_v52 = vadd.f32 %v1106_v10, %v1701_v2 }
  0x66   :  { %v348_v47 = vadd.f32 %v1108_v32, %v1702_v21  ;;  %v349_v43 = vadd.f32 %v1110_v30, %v1703_v3  ;;  %v350_v59 = vadd.f32 %v1112_v50, %v1704_v54  ;;  %v351_v53 = vsub.f32 %v343_v5, %v1249_v45 }
  0x67   :  { %v352_v14 = vsub.f32 %v344_v29, %v1251_v49  ;;  %v353_v42 = vsub.f32 %v345_v18, %v1253_v7  ;;  %v354_v40 = vsub.f32 %v346_v24, %v1255_v61  ;;  %v355_v31 = vsub.f32 %v347_v52, %v1257_v20 }
  0x68   :  { %v359_v10 = vmax.f32 %v351_v53, 1e-06  ;;  %v356_v30 = vsub.f32 %v348_v47, %v1259_v62  ;;  %v357_v46 = vsub.f32 %v349_v43, %v1261_v33  ;;  %v358_v50 = vsub.f32 %v350_v59, %v1263_v4 }
  0x69   :  { %v1286_v17 = vmax.f32 %v352_v14, 1e-06  ;;  %v1288_v32 = vmax.f32 %v353_v42, 1e-06  ;;  %v1293_v37 = vmax.f32 %v354_v40, 1e-06 }
  0x6a   :  { %655 = vrcp.f32 %v359_v10  ;;  %v1295_v38 = vmax.f32 %v355_v31, 1e-06  ;;  %v376_v0 = vand.u32 2147483647, %v359_v10  ;;  %v378_v44 = vand.u32 2147483648, %v359_v10 }
  0x6b   :  { %657 = vrcp.f32 %v1286_v17  ;;  %v391_v8 = vand.u32 2147483647, %v1286_v17  ;;  %v1300_v58 = vmax.f32 %v356_v30, 1e-06  ;;  %v1302_v56 = vmax.f32 %v357_v46, 1e-06 }
  0x6c   :  { %659 = vrcp.f32 %v1288_v32  ;;  %v393_v12 = vand.u32 2147483648, %v1286_v17  ;;  %v408_v16 = vand.u32 2147483648, %v1288_v32  ;;  %v1306_v39 = vmax.f32 %v358_v50, 1e-06 }
  0x6d   :  { %vm372_vm0 = vweird.f32 %v359_v10  ;;  %v406_v22 = vand.u32 2147483647, %v1288_v32  ;;  %661 = vrcp.f32 %v1293_v37  ;;  %vm387_vm1 = vweird.f32 %v1286_v17 }
  0x6e   :  { %vm402_vm2 = vweird.f32 %v1288_v32  ;;  %v421_v55 = vand.u32 2147483647, %v1293_v37  ;;  %v423_v36 = vand.u32 2147483648, %v1293_v37  ;;  %vm1314_vm3 = vcmp.eq.f32.partialorder %v376_v0, 8.507059e+37 }
  0x6f   :  { %v379_v25 = vor.u32 1.1754944e-38, %v378_v44  ;;  %vm1318_vm4 = vcmp.eq.f32.partialorder %v391_v8, 8.507059e+37  ;;  %663 = vrcp.f32 %v1295_v38  ;;  %v394_v35 = vor.u32 1.1754944e-38, %v393_v12 }
  0x70   :  { %v656_v23 = vpop.eup %655  ;;  %v409_v13 = vor.u32 1.1754944e-38, %v408_v16  ;;  %vm417_vm5 = vweird.f32 %v1293_v37  ;;  %vm1325_vm7 = vcmp.eq.f32.partialorder %v406_v22, 8.507059e+37  ;;  %v436_v19 = vand.u32 2147483647, %v1295_v38 }
  0x71   :  { %v658_v48 = vpop.eup %657  ;;  %v368_v15 = vmul.f32 %v656_v23, %v359_v10  ;;  %vm373_vm6 = vweird.f32 %v656_v23  ;;  %v438_v9 = vand.u32 2147483648, %v1295_v38  ;;  %vm1333_vm9 = vcmp.eq.f32.partialorder %v421_v55, 8.507059e+37 }
  0x72   :  { %v660_v63 = vpop.eup %659  ;;  %v383_v28 = vmul.f32 %v658_v48, %v1286_v17  ;;  %v424_v34 = vor.u32 1.1754944e-38, %v423_v36  ;;  %665 = vrcp.f32 %v1300_v58  ;;  %vm388_vm10 = vweird.f32 %v658_v48  ;;  %vm1343_vm12 = vmor %vm372_vm0, %vm373_vm6 }
  0x73   :  { %v369_v11 = vsub.f32 1.0, %v368_v15  ;;  %v398_v51 = vmul.f32 %v660_v63, %v1288_v32  ;;  %v662_v5 = vpop.eup %661  ;;  %v451_v29 = vand.u32 2147483647, %v1300_v58  ;;  %v453_v6 = vand.u32 2147483648, %v1300_v58  ;;  %vm1355_vm15 = vmor %vm387_vm1, %vm388_vm10 }
  0x74   :  { %v384_v41 = vsub.f32 1.0, %v383_v28  ;;  %vm403_vm11 = vweird.f32 %v660_v63  ;;  %v413_v24 = vmul.f32 %v662_v5, %v1293_v37  ;;  %vm418_vm13 = vweird.f32 %v662_v5 }
  0x75   :  { %v370_v18 = vmul.f32 %v656_v23, %v369_v11  ;;  %v399_v1 = vsub.f32 1.0, %v398_v51  ;;  %v664_v2 = vpop.eup %663  ;;  %vm1347_vm14 = vcmp.eq.f32.partialorder %v436_v19, 8.507059e+37  ;;  %v439_v3 = vor.u32 1.1754944e-38, %v438_v9  ;;  %vm1363_vm0 = vmor %vm402_vm2, %vm403_vm11 }
  0x76   :  { %v385_v21 = vmul.f32 %v658_v48, %v384_v41  ;;  %667 = vrcp.f32 %v1302_v56  ;;  %v414_v53 = vsub.f32 1.0, %v413_v24  ;;  %v428_v14 = vmul.f32 %v664_v2, %v1295_v38  ;;  %vm1381_vm1 = vmor %vm417_vm5, %vm418_vm13 }
  0x77   :  { %v371_v43 = vadd.f32 %v656_v23, %v370_v18  ;;  %v400_v59 = vmul.f32 %v660_v63, %v399_v1  ;;  %vm447_vm6 = vweird.f32 %v1300_v58  ;;  %vm1368_vm8 = vcmp.eq.f32.partialorder %v451_v29, 8.507059e+37 }
  0x78   :  { %v386_v42 = vadd.f32 %v658_v48, %v385_v21  ;;  %v454_v10 = vor.u32 1.1754944e-38, %v453_v6  ;;  %v666_v17 = vpop.eup %665  ;;  %v415_v50 = vmul.f32 %v662_v5, %v414_v53  ;;  %v429_v0 = vsub.f32 1.0, %v428_v14 }
  0x79   :  { %v375_v30 = vsel %vm1343_vm12, %v656_v23, %v371_v43  ;;  %v401_v46 = vadd.f32 %v660_v63, %v400_v59  ;;  %vm433_vm2 = vweird.f32 %v664_v2  ;;  %v443_v12 = vmul.f32 %v666_v17, %v1300_v58 }
  0x7a   :  { %v380_v32 = vsel %vm1314_vm3, %v379_v25, %v375_v30  ;;  %v390_v44 = vsel %vm1355_vm15, %v658_v48, %v386_v42  ;;  %v416_v55 = vadd.f32 %v662_v5, %v415_v50  ;;  %vm462_vm3 = vweird.f32 %v1302_v56 }
  0x7b   :  { %v395_v16 = vsel %vm1318_vm4, %v394_v35, %v390_v44  ;;  %v405_v22 = vsel %vm1363_vm0, %v660_v63, %v401_v46  ;;  %v430_v23 = vmul.f32 %v664_v2, %v429_v0  ;;  %v444_v27 = vsub.f32 1.0, %v443_v12 }
  0x7c   :  { %v668_v36 = vpop.eup %667  ;;  %vm448_vm10 = vweird.f32 %v666_v17  ;;  %v466_v37 = vand.u32 2147483647, %v1302_v56  ;;  %v1393_v25 = vmul.f32 %v380_v32, %v1249_v45  ;;  %v410_v48 = vsel %vm1325_vm7, %v409_v13, %v405_v22 }
  0x7d   :  { %v420_v26 = vsel %vm1381_vm1, %v662_v5, %v416_v55  ;;  %vm1725_vm4 = vweird.f32 %v1295_v38  ;;  %v458_v35 = vmul.f32 %v668_v36, %v1302_v56  ;;  %v1407_v63 = vmul.f32 %v395_v16, %v1251_v49  ;;  %vm1413_vm7 = vmor %vm447_vm6, %vm448_vm10 }
  0x7e   :  { %vm1401_vm5 = vmor %vm1725_vm4, %vm433_vm2  ;;  %v425_v45 = vsel %vm1333_vm9, %v424_v34, %v420_v26  ;;  %v431_v28 = vadd.f32 %v664_v2, %v430_v23  ;;  %v445_v57 = vmul.f32 %v666_v17, %v444_v27  ;;  %vm463_vm11 = vweird.f32 %v668_v36 }
  0x7f   :  { %v459_v38 = vsub.f32 1.0, %v458_v35  ;;  %v468_v19 = vand.u32 2147483648, %v1302_v56  ;;  %669 = vrcp.f32 %v1306_v39  ;;  %v1420_v49 = vmul.f32 %v410_v48, %v1253_v7  ;;  %vm464_vm9 = vmor %vm462_vm3, %vm463_vm11 }
  0x80   :  { %v1423_v9 = vmul.f32 %v425_v45, %v1255_v61  ;;  %v435_v11 = vsel %vm1401_vm5, %v664_v2, %v431_v28  ;;  %v446_v58 = vadd.f32 %v666_v17, %v445_v57  ;;  %v487_v61 = vsub.f32 1.0, %v1393_v25 }
  0x81   :  { %v440_v51 = vsel %vm1347_vm14, %v439_v3, %v435_v11  ;;  %v460_v60 = vmul.f32 %v668_v36, %v459_v38  ;;  %v469_v7 = vor.u32 1.1754944e-38, %v468_v19  ;;  %vm467_vm12 = vcmp.eq.f32.partialorder %v466_v37, 8.507059e+37 }
  0x82   :  { %v1430_v34 = vmul.f32 %v440_v51, %v1257_v20  ;;  %v450_v5 = vsel %vm1413_vm7, %v666_v17, %v446_v58  ;;  %v488_v6 = vsub.f32 1.0, %v1407_v63  ;;  %v489_v20 = vsub.f32 1.0, %v1420_v49 }
  0x83   :  { %v455_v41 = vsel %vm1368_vm8, %v454_v10, %v450_v5  ;;  %v461_v29 = vadd.f32 %v668_v36, %v460_v60  ;;  %v490_v1 = vsub.f32 1.0, %v1423_v9  ;;  %v726_v3 = vmov 0.0  }
  0x84   :  { %v1441_v18 = vmul.f32 %v455_v41, %v1259_v62  ;;  %v491_v56 = vsub.f32 1.0, %v1430_v34  ;;  %36 = vst [vmem:[#allocation2 + $0x30] sm:$0xff] %v726_v3  ;;  %v483_v62 = vand.u32 2147483648, %v1306_v39  ;;  %vm477_vm8 = vweird.f32 %v1306_v39 }
  0x85   :  { %v670_v24 = vpop.eup %669  ;;  %v465_v2 = vsel %vm464_vm9, %v668_v36, %v461_v29  ;;  %37 = vst [vmem:[#allocation2] sm:$0xff] %v726_v3  ;;  %v481_v59 = vand.u32 2147483647, %v1306_v39 }
  0x86   :  { %v470_v52 = vsel %vm467_vm12, %v469_v7, %v465_v2  ;;  %v473_v21 = vmul.f32 %v670_v24, %v1306_v39  ;;  %v492_v47 = vsub.f32 1.0, %v1441_v18  ;;  %vm478_vm13 = vweird.f32 %v670_v24  ;;  %38 = vst [vmem:[#allocation2 + $0x18] sm:$0xff] %v726_v3 }
  0x87   :  { %v1449_v43 = vmul.f32 %v470_v52, %v1261_v33  ;;  %39 = vst [vmem:[#allocation2 + $0x10] sm:$0xff] %v726_v3  ;;  %vm479_vm14 = vmor %vm477_vm8, %vm478_vm13  ;;  %v484_v42 = vor.u32 1.1754944e-38, %v483_v62  ;;  %vm482_vm15 = vcmp.eq.f32.partialorder %v481_v59, 8.507059e+37 }
  0x88   :  { %v474_v54 = vsub.f32 1.0, %v473_v21  ;;  %40 = vst [vmem:[#allocation2 + $0x8] sm:$0xff] %v726_v3 }
  0x89   :  { %v493_v53 = vsub.f32 1.0, %v1449_v43  ;;  %41 = vst [vmem:[#allocation2 + $0x20] sm:$0xff] %v726_v3 }
  0x8a   :  { %v475_v14 = vmul.f32 %v670_v24, %v474_v54  ;;  %42 = vst [vmem:[#allocation2 + $0x28] sm:$0xff] %v726_v3 }
  0x8b   :  { %43 = vst [vmem:[#allocation2 + $0x38] sm:$0xff] %v726_v3 }
  0x8c   :  { %v476_v33 = vadd.f32 %v670_v24, %v475_v14 }
  0x8e   :  { %v480_v40 = vsel %vm479_vm14, %v670_v24, %v476_v33  ;;  %502 = sbr.rel (%p645_p0) target bundleno = 158 (0x9e), region = 17 }
  0x8f   :  { %v485_v31 = vsel %vm482_vm15, %v484_v42, %v480_v40 }
  0x90   :  { %v1456_v10 = vmul.f32 %v485_v31, %v1263_v4 }
  0x92   :  { %v494_v39 = vsub.f32 1.0, %v1456_v10 }
  0x93   :  { %v503_v17 = vld [vmem:[#allocation2 + $0x30] sm:$0xff]  ;;  %v504_v30 = vld [vmem:[#allocation2] sm:$0xff]  ;;  %v505_v46 = vld [vmem:[#allocation2 + $0x18] sm:$0xff] }
  0x94   :  { %v511_v50 = vadd.f32 %v503_v17, %v487_v61  ;;  %v512_v0 = vadd.f32 %v504_v30, %v488_v6  ;;  %v513_v4 = vadd.f32 %v505_v46, %v489_v20  ;;  %v506_v32 = vld [vmem:[#allocation2 + $0x10] sm:$0xff]  ;;  %v507_v44 = vld [vmem:[#allocation2 + $0x8] sm:$0xff]  ;;  %v508_v8 = vld [vmem:[#allocation2 + $0x20] sm:$0xff] }
  0x95   :  { %v514_v12 = vadd.f32 %v506_v32, %v490_v1  ;;  %v509_v16 = vld [vmem:[#allocation2 + $0x28] sm:$0xff]  ;;  %v515_v22 = vadd.f32 %v507_v44, %v491_v56  ;;  %v510_v55 = vld [vmem:[#allocation2 + $0x38] sm:$0xff]  ;;  %v516_v36 = vadd.f32 %v508_v8, %v492_v47 }
  0x96   :  { %519 = vst [vmem:[#allocation2 + $0x30] sm:$0xff] %v511_v50  ;;  %v517_v23 = vadd.f32 %v509_v16, %v493_v53  ;;  %v518_v27 = vadd.f32 %v510_v55, %v494_v39 }
  0x97   :  { %520 = vst [vmem:[#allocation2] sm:$0xff] %v512_v0 }
  0x98   :  { %521 = vst [vmem:[#allocation2 + $0x18] sm:$0xff] %v513_v4 }
  0x99   :  { %522 = vst [vmem:[#allocation2 + $0x10] sm:$0xff] %v514_v12 }
  0x9a   :  { %523 = vst [vmem:[#allocation2 + $0x8] sm:$0xff] %v515_v22 }
  0x9b   :  { %524 = vst [vmem:[#allocation2 + $0x20] sm:$0xff] %v516_v36 }
  0x9c   :  { %525 = vst [vmem:[#allocation2 + $0x28] sm:$0xff] %v517_v23 }
  0x9d   :  { %526 = vst [vmem:[#allocation2 + $0x38] sm:$0xff] %v518_v27 }
  0x9e PF:  { %p647_p1 = scmp.ge.s32.totalorder %s1503_s0, 8192 }
  0xa0   :  { %530 = sbr.rel (%p647_p1) target bundleno = 185 (0xb9), region = 21 }
  0xa5   :  { %v531_v37 = vlaneseq  ;;  %v561_v15 = vstv %s1503_s0  ;;  %v553_v51 = vld [vmem:[#allocation2 + $0x30] sm:$0xff]  ;;  %v554_v41 = vld [vmem:[#allocation2] sm:$0xff]  ;;  %v555_v29 = vld [vmem:[#allocation2 + $0x18] sm:$0xff] }
  0xa6   :  { %v556_v24 = vld [vmem:[#allocation2 + $0x10] sm:$0xff]  ;;  %v557_v17 = vld [vmem:[#allocation2 + $0x8] sm:$0xff]  ;;  %v558_v30 = vld [vmem:[#allocation2 + $0x20] sm:$0xff] }
  0xa7   :  { %v532_v48 = vshrl.u32 %v531_v37, 7  ;;  %v534_v26 = vand.u32 127, %v531_v37  ;;  %v559_v46 = vld [vmem:[#allocation2 + $0x28] sm:$0xff]  ;;  %v560_v9 = vld [vmem:[#allocation2 + $0x38] sm:$0xff] }
  0xa9   :  { %v542_v35 = vmul.u32 1024, %v532_v48  ;;  %v535_v45 = vadd.s32 128, %v534_v26  ;;  %v536_v28 = vadd.s32 256, %v534_v26  ;;  %v537_v57 = vadd.s32 384, %v534_v26 }
  0xaa   :  { %v538_v13 = vadd.s32 512, %v534_v26  ;;  %v539_v38 = vadd.s32 640, %v534_v26  ;;  %v540_v19 = vadd.s32 768, %v534_v26  ;;  %v541_v11 = vadd.s32 896, %v534_v26 }
  0xab   :  { %v545_v58 = vadd.s32 %v542_v35, %v534_v26  ;;  %v546_v60 = vadd.s32 %v542_v35, %v535_v45  ;;  %v547_v5 = vadd.s32 %v542_v35, %v536_v28  ;;  %v548_v7 = vadd.s32 %v542_v35, %v537_v57 }
  0xac   :  { %v549_v2 = vadd.s32 %v542_v35, %v538_v13  ;;  %v550_v52 = vadd.s32 %v542_v35, %v539_v38  ;;  %v551_v21 = vadd.s32 %v542_v35, %v540_v19  ;;  %v552_v3 = vadd.s32 %v542_v35, %v541_v11 }
  0xad   :  { %vm562_vm0 = vcmp.lt.s32.totalorder %v545_v58, %v561_v15  ;;  %vm563_vm6 = vcmp.lt.s32.totalorder %v546_v60, %v561_v15  ;;  %vm564_vm1 = vcmp.lt.s32.totalorder %v547_v5, %v561_v15  ;;  %vm565_vm2 = vcmp.lt.s32.totalorder %v548_v7, %v561_v15 }
  0xae   :  { %v570_v62 = vsel %vm562_vm0, %v487_v61, 0.0  ;;  %v571_v54 = vsel %vm563_vm6, %v488_v6, 0.0  ;;  %v572_v59 = vsel %vm564_vm1, %v489_v20, 0.0  ;;  %v573_v14 = vsel %vm565_vm2, %v490_v1, 0.0 }
  0xaf   :  { %v578_v42 = vadd.f32 %v570_v62, %v553_v51  ;;  %v579_v33 = vadd.f32 %v571_v54, %v554_v41  ;;  %v580_v40 = vadd.f32 %v572_v59, %v555_v29  ;;  %v581_v31 = vadd.f32 %v573_v14, %v556_v24 }
  0xb0   :  { %vm566_vm3 = vcmp.lt.s32.totalorder %v549_v2, %v561_v15  ;;  %vm567_vm10 = vcmp.lt.s32.totalorder %v550_v52, %v561_v15  ;;  %vm568_vm4 = vcmp.lt.s32.totalorder %v551_v21, %v561_v15  ;;  %vm569_vm5 = vcmp.lt.s32.totalorder %v552_v3, %v561_v15 }
  0xb1   :  { %586 = vst [vmem:[#allocation2 + $0x30] sm:$0xff] %v578_v42  ;;  %v574_v25 = vsel %vm566_vm3, %v491_v56, 0.0  ;;  %v575_v63 = vsel %vm567_vm10, %v492_v47, 0.0  ;;  %v576_v49 = vsel %vm568_vm4, %v493_v53, 0.0  ;;  %v577_v61 = vsel %vm569_vm5, %v494_v39, 0.0 }
  0xb2   :  { %587 = vst [vmem:[#allocation2] sm:$0xff] %v579_v33  ;;  %v582_v6 = vadd.f32 %v574_v25, %v557_v17  ;;  %v583_v20 = vadd.f32 %v575_v63, %v558_v30  ;;  %v584_v1 = vadd.f32 %v576_v49, %v559_v46  ;;  %v585_v50 = vadd.f32 %v577_v61, %v560_v9 }
  0xb3   :  { %588 = vst [vmem:[#allocation2 + $0x18] sm:$0xff] %v580_v40 }
  0xb4   :  { %589 = vst [vmem:[#allocation2 + $0x10] sm:$0xff] %v581_v31 }
  0xb5   :  { %590 = vst [vmem:[#allocation2 + $0x8] sm:$0xff] %v582_v6 }
  0xb6   :  { %591 = vst [vmem:[#allocation2 + $0x20] sm:$0xff] %v583_v20 }
  0xb7   :  { %592 = vst [vmem:[#allocation2 + $0x28] sm:$0xff] %v584_v1 }
  0xb8   :  { %593 = vst [vmem:[#allocation2 + $0x38] sm:$0xff] %v585_v50 }
  0xb9 PF:  { %v597_v34 = vld [vmem:[#allocation2 + $0x30] sm:$0xff]  ;;  %v598_v18 = vld [vmem:[#allocation2] sm:$0xff]  ;;  %v621_v26 = vlaneseq  ;;  %s727_s0 = smov [#allocation8]   ;;  %s634_s24 = sshll.u32 %s1505_s2, 4  ;;  %s635_s24 = int_to_ptr.hbm [resolvable:$true] %s634_s24 }
  0xba   :  { %v599_v56 = vld [vmem:[#allocation2 + $0x18] sm:$0xff]  ;;  %v605_v47 = vadd.f32 %v598_v18, %v597_v34  ;;  %s632_s21 = sshll.u32 %s727_s0, 4  ;;  %s633_s21 = int_to_ptr.vmem [resolvable:$true] %s632_s21 }
  0xbb   :  { %v600_v43 = vld [vmem:[#allocation2 + $0x10] sm:$0xff]  ;;  %v622_v15 = vand.u32 127, %v621_v26 }
  0xbc   :  { %v606_v53 = vadd.f32 %v605_v47, %v599_v56  ;;  %v601_v10 = vld [vmem:[#allocation2 + $0x8] sm:$0xff] }
  0xbd   :  { %v602_v0 = vld [vmem:[#allocation2 + $0x20] sm:$0xff]  ;;  %vm623_vm7 = vcmp.eq.s32.totalorder %v622_v15, 0 }
  0xbe   :  { %v607_v39 = vadd.f32 %v606_v53, %v600_v43  ;;  %v603_v32 = vld [vmem:[#allocation2 + $0x28] sm:$0xff] }
  0xbf   :  { %v604_v8 = vld [vmem:[#allocation2 + $0x38] sm:$0xff] }
  0xc0   :  { %v608_v4 = vadd.f32 %v607_v39, %v601_v10 }
  0xc2   :  { %v609_v44 = vadd.f32 %v608_v4, %v602_v0 }
  0xc4   :  { %v610_v12 = vadd.f32 %v609_v44, %v603_v32 }
  0xc6   :  { %v611_v16 = vadd.f32 %v610_v12, %v604_v8 }
  0xc8   :  { %612 = vadd.xlane.f32.xlu0 %v611_v16 }
 0x13b   :  { %v613_v22 = vpop.xlane.xlu0 %612 }
 0x13c   :  { %v614_v55 = vrot.slane %v613_v22, 4 }
 0x13e   :  { %v615_v36 = vadd.f32 %v614_v55, %v613_v22 }
 0x140   :  { %v616_v23 = vrot.slane %v615_v36, 2 }
 0x142   :  { %v617_v27 = vadd.f32 %v616_v23, %v615_v36 }
 0x144   :  { %v618_v37 = vrot.slane %v617_v27, 1 }
 0x146   :  { %v619_v48 = vadd.f32 %v618_v37, %v617_v27 }
 0x148   :  { %648 = vpush %v619_v48 }
 0x179   :  { %s649_s25 = spop %648 }
 0x17a   :  { %v624_v35 = vstv %s649_s25 }
 0x17b   :  { %v625_v45 = vsel %vm623_vm7, %v624_v35, 0.0 }
 0x17c   :  { %626 = vst [vmem:[#allocation8] sm:$0x1] %v625_v45 }
 0x17d   :  { %637 = dma.vmem_to_hbm [thread:$0]  %s633_s21, 16, %s635_s24, [#allocation7]  }
 0x17e   :  { %721 = dma.done.wait [#allocation7], 16  }
 0x17f   :  { %722 = vsyncadd [#allocation7], 4294967280 }
 0x180   :  { %642 = vsyncpa [#allocation6], 1 }
 0x181   :  { %643 = vsyncpa [#allocation7], 1 }

</bundles_post_ra>
